<compile_context>
chip_gen: v7x
topology: tpu7x:2x2x1
jax: 0.10.0
libtpu: 0.0.40
codegen_flags: <defaults>
</compile_context>

<pallas_src>
import jax
import jax.numpy as jnp
from jax.experimental import pallas as pl
from jax.experimental.pallas import tpu as pltpu

LANE = 128
SUBLANE = 8


def _round_up(x, m):
    return ((x + m - 1) // m) * m


def rbf_kernel(x_ref, cneg2t_ref, c2_ref, beta_ref, wt_ref, b_ref, o_ref):
    # x:      (TILE_N, Dp)  bf16   (streamed, double-buffered)
    # cneg2t: (Dp, Kp)      bf16   (= -2 * centers^T, resident)
    # c2:     (1, Kp)       f32    (= ||centers||^2, hoisted to wrapper)
    # beta:   (1, Kp)       f32
    # wt:     (Kp, Cp)      f32    (= linear.weight^T, zero-padded)
    # b:      (1, Cp)       f32
    x = x_ref[...]                                      # bf16, fed to MXU directly

    # ||x||^2 in f32 (per-row, cross-lane reduce on XLU)
    xf = x.astype(jnp.float32)
    x2 = jnp.sum(xf * xf, axis=1, keepdims=True)        # (TILE_N, 1)

    # -2 * x . c on the MXU: bf16 operands, f32 accumulation
    xc2 = jnp.dot(x, cneg2t_ref[...],
                  preferred_element_type=jnp.float32)   # (TILE_N, Kp)

    # ||x - c||^2 = ||x||^2 + ||c||^2 - 2 x.c   (clamp fp cancellation noise)
    d2 = jnp.maximum(x2 + c2_ref[...] + xc2, 0.0)
    dist = jnp.sqrt(d2)                                 # (TILE_N, Kp) f32
    radial = jnp.exp(-beta_ref[...] * dist)             # (TILE_N, Kp) f32

    # Linear layer: (TILE_N, Kp) @ (Kp, Cp) + bias   (small, stays f32)
    out = jnp.dot(radial, wt_ref[...],
                  preferred_element_type=jnp.float32)
    o_ref[...] = out + b_ref[...]


def rbf_net_forward(x_nchw, centers, beta, weight, bias, *, tile_n=1024):
    """x_nchw: (N, C, H, W); centers: (K, D); beta: (1, K);
    weight: (num_class, K); bias: (num_class,)."""
    n = x_nchw.shape[0]
    x = x_nchw.reshape(n, -1)                           # (N, D)
    k, d = centers.shape
    assert x.shape[1] == d, "feature dim mismatch with centers"
    num_class = weight.shape[0]

    # Lane / sublane padding.
    d_pad = _round_up(d, LANE)
    k_pad = _round_up(k, LANE)
    c_pad = _round_up(num_class, LANE)

    # Batch tiling (tile must be a multiple of the 8-row sublane granule).
    tile_n = max(SUBLANE, min(_round_up(tile_n, SUBLANE), _round_up(n, SUBLANE)))
    n_pad = _round_up(n, tile_n)
    grid_n = n_pad // tile_n

    # ---- wrapper-side (plain JAX) prep: pad, cast, hoist center terms ----
    xb = jnp.zeros((n_pad, d_pad), jnp.bfloat16).at[:n, :d].set(
        x.astype(jnp.bfloat16))
    cb = jnp.zeros((k_pad, d_pad), jnp.bfloat16).at[:k, :d].set(
        centers.astype(jnp.bfloat16))
    cf = cb.astype(jnp.float32)
    c2 = jnp.sum(cf * cf, axis=1, keepdims=True).T              # (1, Kp) f32
    cneg2t = (-2.0 * cf).astype(jnp.bfloat16).T                 # (Dp, Kp) bf16 (exact)

    beta_p = jnp.zeros((1, k_pad), jnp.float32).at[:, :k].set(
        beta.reshape(1, k).astype(jnp.float32))
    wt_p = jnp.zeros((k_pad, c_pad), jnp.float32).at[:k, :num_class].set(
        weight.T.astype(jnp.float32))                           # zero rows for padded K
    b_p = jnp.zeros((1, c_pad), jnp.float32).at[:, :num_class].set(
        bias.reshape(1, num_class).astype(jnp.float32))

    cost = pl.CostEstimate(
        flops=2 * n_pad * d_pad * k_pad + 2 * n_pad * k_pad * c_pad,
        transcendentals=2 * n_pad * k_pad,
        bytes_accessed=(n_pad * d_pad * 2 + d_pad * k_pad * 2
                        + n_pad * c_pad * 4 + k_pad * c_pad * 4
                        + 3 * k_pad * 4),
    )

    out = pl.pallas_call(
        rbf_kernel,
        out_shape=jax.ShapeDtypeStruct((n_pad, c_pad), jnp.float32),
        grid=(grid_n,),
        in_specs=[
            pl.BlockSpec((tile_n, d_pad), lambda i: (i, 0)),    # x (streamed)
            pl.BlockSpec((d_pad, k_pad), lambda i: (0, 0)),     # -2 * centers^T
            pl.BlockSpec((1, k_pad), lambda i: (0, 0)),         # ||c||^2
            pl.BlockSpec((1, k_pad), lambda i: (0, 0)),         # beta
            pl.BlockSpec((k_pad, c_pad), lambda i: (0, 0)),     # W^T (padded)
            pl.BlockSpec((1, c_pad), lambda i: (0, 0)),         # bias (padded)
        ],
        out_specs=pl.BlockSpec((tile_n, c_pad), lambda i: (i, 0)),
        compiler_params=pltpu.CompilerParams(
            dimension_semantics=("parallel",),
            vmem_limit_bytes=48 * 1024 * 1024,
        ),
        cost_estimate=cost,
    )(xb, cneg2t, c2, beta_p, wt_p, b_p)

    return out[:n, :num_class]


if __name__ == "__main__":
    key = jax.random.PRNGKey(0)
    k_x, k_c, k_w, k_b = jax.random.split(key, 4)

    # Small shapes consistent with the module: images (N, C, H, W) flattened
    # to D = C*H*W features; K RBF centers over the same D; num_class outputs.
    N, C, H, W = 2, 4, 16, 16
    D = C * H * W
    K = 32            # num_centers
    NUM_CLASS = 10

    x = jax.random.normal(k_x, (N, C, H, W), dtype=jnp.float32)
    centers = jax.random.normal(k_c, (K, D), dtype=jnp.float32)
    beta = jnp.ones((1, K), dtype=jnp.float32) / 10.0           # as in __init__
    weight = 0.1 * jax.random.normal(k_w, (NUM_CLASS, K), dtype=jnp.float32)
    bias = 0.1 * jax.random.normal(k_b, (NUM_CLASS,), dtype=jnp.float32)

    out = rbf_net_forward(x, centers, beta, weight, bias)
    out = jax.block_until_ready(out)

    # Pure-JAX f32 reference (mirrors the PyTorch broadcast/reduce path).
    xf = x.reshape(N, -1)
    diff = centers[None, :, :] - xf[:, None, :]                 # (N, K, D)
    dist = jnp.sqrt(jnp.sum(diff * diff, axis=2))               # (N, K)
    radial = jnp.exp(-beta * dist)
    ref = radial @ weight.T + bias

    assert out.shape == (N, NUM_CLASS)
    # bf16 MXU operands -> slightly looser tolerance than pure-f32.
    assert jnp.allclose(out, ref, atol=1e-3, rtol=1e-3), (out, ref)
    print("KERNEL_OK")
</pallas_src>

<mosaic_0001>
module attributes {stable_mosaic.version = 11 : i64} {
  func.func @rbf_kernel(%arg0: i32, %arg1: memref<8x1024xbf16, #tpu.memory_space<vmem>>, %arg2: memref<1024x128xbf16, #tpu.memory_space<vmem>>, %arg3: memref<1x128xf32, #tpu.memory_space<vmem>>, %arg4: memref<1x128xf32, #tpu.memory_space<vmem>>, %arg5: memref<128x128xf32, #tpu.memory_space<vmem>>, %arg6: memref<1x128xf32, #tpu.memory_space<vmem>>, %arg7: memref<8x128xf32, #tpu.memory_space<vmem>>) attributes {dimension_semantics = [#tpu.dimension_semantics<parallel>], iteration_bounds = array<i64: 1>, scalar_prefetch = 0 : i64, scratch_operands = 0 : i64, tpu.core_type = #tpu.core_type<tc>, window_params = [{transform_indices = @transform_0, window_bounds = array<i64: 8, 1024>}, {pipeline_mode = #tpu.pipeline_mode<synchronous>, transform_indices = @transform_1, window_bounds = array<i64: 1024, 128>}, {pipeline_mode = #tpu.pipeline_mode<synchronous>, transform_indices = @transform_2, window_bounds = array<i64: 1, 128>}, {pipeline_mode = #tpu.pipeline_mode<synchronous>, transform_indices = @transform_3, window_bounds = array<i64: 1, 128>}, {pipeline_mode = #tpu.pipeline_mode<synchronous>, transform_indices = @transform_4, window_bounds = array<i64: 128, 128>}, {pipeline_mode = #tpu.pipeline_mode<synchronous>, transform_indices = @transform_5, window_bounds = array<i64: 1, 128>}, {transform_indices = @transform_6, window_bounds = array<i64: 8, 128>}]} {
    %c0 = arith.constant 0 : index
    %c0_0 = arith.constant 0 : index
    %0 = vector.load %arg1[%c0, %c0_0] : memref<8x1024xbf16, #tpu.memory_space<vmem>>, vector<8x1024xbf16>
    %1 = arith.extf %0 : vector<8x1024xbf16> to vector<8x1024xf32>
    %2 = arith.mulf %1, %1 : vector<8x1024xf32>
    %cst = arith.constant dense<0.000000e+00> : vector<8xf32>
    %3 = vector.multi_reduction <add>, %2, %cst [1] : vector<8x1024xf32> to vector<8xf32>
    %4 = vector.shape_cast %3 : vector<8xf32> to vector<8x1xf32>
    %c0_1 = arith.constant 0 : index
    %c0_2 = arith.constant 0 : index
    %5 = vector.load %arg2[%c0_1, %c0_2] : memref<1024x128xbf16, #tpu.memory_space<vmem>>, vector<1024x128xbf16>
    %cst_3 = arith.constant dense<0.000000e+00> : vector<8x128xf32>
    %6 = tpu.matmul %0, %5, %cst_3 {dimension_numbers = #tpu.dot_dimension_numbers<[1], [0], [0], [1], [0, 0, 1, 1], [], []>} : vector<8x1024xbf16>, vector<1024x128xbf16>, vector<8x128xf32> -> vector<8x128xf32>
    %c0_4 = arith.constant 0 : index
    %c0_5 = arith.constant 0 : index
    %7 = vector.load %arg3[%c0_4, %c0_5] : memref<1x128xf32, #tpu.memory_space<vmem>>, vector<1x128xf32>
    %8 = vector.broadcast %4 : vector<8x1xf32> to vector<8x128xf32>
    %9 = vector.broadcast %7 : vector<1x128xf32> to vector<8x128xf32>
    %10 = arith.addf %8, %9 : vector<8x128xf32>
    %11 = arith.addf %10, %6 : vector<8x128xf32>
    %cst_6 = arith.constant 0.000000e+00 : f32
    %12 = vector.broadcast %cst_6 : f32 to vector<8x128xf32>
    %13 = arith.maximumf %11, %12 : vector<8x128xf32>
    %14 = math.sqrt %13 : vector<8x128xf32>
    %c0_7 = arith.constant 0 : index
    %c0_8 = arith.constant 0 : index
    %15 = vector.load %arg4[%c0_7, %c0_8] : memref<1x128xf32, #tpu.memory_space<vmem>>, vector<1x128xf32>
    %cst_9 = arith.constant 0.000000e+00 : f32
    %16 = vector.broadcast %cst_9 : f32 to vector<1x128xf32>
    %17 = arith.subf %16, %15 : vector<1x128xf32>
    %18 = vector.broadcast %17 : vector<1x128xf32> to vector<8x128xf32>
    %19 = arith.mulf %18, %14 : vector<8x128xf32>
    %20 = math.exp %19 : vector<8x128xf32>
    %c0_10 = arith.constant 0 : index
    %c0_11 = arith.constant 0 : index
    %21 = vector.load %arg5[%c0_10, %c0_11] : memref<128x128xf32, #tpu.memory_space<vmem>>, vector<128x128xf32>
    %cst_12 = arith.constant dense<0.000000e+00> : vector<8x128xf32>
    %22 = tpu.matmul %20, %21, %cst_12 {dimension_numbers = #tpu.dot_dimension_numbers<[1], [0], [0], [1], [0, 0, 1, 1], [], []>} : vector<8x128xf32>, vector<128x128xf32>, vector<8x128xf32> -> vector<8x128xf32>
    %c0_13 = arith.constant 0 : index
    %c0_14 = arith.constant 0 : index
    %23 = vector.load %arg6[%c0_13, %c0_14] : memref<1x128xf32, #tpu.memory_space<vmem>>, vector<1x128xf32>
    %24 = vector.broadcast %23 : vector<1x128xf32> to vector<8x128xf32>
    %25 = arith.addf %22, %24 : vector<8x128xf32>
    %c0_15 = arith.constant 0 : index
    %c0_16 = arith.constant 0 : index
    %26 = vector.load %arg7[%c0_15, %c0_16] : memref<8x128xf32, #tpu.memory_space<vmem>>, vector<8x128xf32>
    tpu.vector_store %arg7[%c0_15, %c0_16], %25 {strides = array<i32>} : memref<8x128xf32, #tpu.memory_space<vmem>>, vector<8x128xf32>,
    return
  }
  func.func @transform_0(%arg0: i32) -> (i32, i32) {
    %c0_i32 = arith.constant 0 : i32
    %c0_i32_0 = arith.constant 0 : i32
    return %arg0, %c0_i32 : i32, i32
  }
  func.func @transform_1(%arg0: i32) -> (i32, i32) {
    %c0_i32 = arith.constant 0 : i32
    %c0_i32_0 = arith.constant 0 : i32
    %c0_i32_1 = arith.constant 0 : i32
    return %c0_i32, %c0_i32_0 : i32, i32
  }
  func.func @transform_2(%arg0: i32) -> (i32, i32) {
    %c0_i32 = arith.constant 0 : i32
    %c0_i32_0 = arith.constant 0 : i32
    %c0_i32_1 = arith.constant 0 : i32
    return %c0_i32, %c0_i32_0 : i32, i32
  }
  func.func @transform_3(%arg0: i32) -> (i32, i32) {
    %c0_i32 = arith.constant 0 : i32
    %c0_i32_0 = arith.constant 0 : i32
    %c0_i32_1 = arith.constant 0 : i32
    return %c0_i32, %c0_i32_0 : i32, i32
  }
  func.func @transform_4(%arg0: i32) -> (i32, i32) {
    %c0_i32 = arith.constant 0 : i32
    %c0_i32_0 = arith.constant 0 : i32
    %c0_i32_1 = arith.constant 0 : i32
    return %c0_i32, %c0_i32_0 : i32, i32
  }
  func.func @transform_5(%arg0: i32) -> (i32, i32) {
    %c0_i32 = arith.constant 0 : i32
    %c0_i32_0 = arith.constant 0 : i32
    %c0_i32_1 = arith.constant 0 : i32
    return %c0_i32, %c0_i32_0 : i32, i32
  }
  func.func @transform_6(%arg0: i32) -> (i32, i32) {
    %c0_i32 = arith.constant 0 : i32
    %c0_i32_0 = arith.constant 0 : i32
    return %arg0, %c0_i32 : i32, i32
  }
}

</mosaic_0001>

<bundles_post_ra>
// kernel: tpu_custom_call.1
= control target key start
LH: loop header
LB: loop body
LE: loop exit
PB: predicated region body
PF: predicated region fallthrough
CT: control target
= control target key end

     0   :  { %11 = vsyncpa [#allocation3], 0  ;;  %s1461_s0 = inlined_call_operand.hbm [shape: bf16[8,1024], index: 0, kind: input, shape index: {}]   ;;  %s1462_s1 = inlined_call_operand.hbm [shape: bf16[1024,128], index: 1, kind: input, shape index: {}]   ;;  %s1463_s2 = inlined_call_operand.vmem [shape: f32[1,128], index: 2, kind: input, shape index: {}]   ;;  %s1464_s3 = inlined_call_operand.vmem [shape: f32[1,128], index: 3, kind: input, shape index: {}]   ;;  %s1465_s4 = inlined_call_operand.hbm [shape: f32[128,128], index: 4, kind: input, shape index: {}]   ;;  %s1466_s5 = inlined_call_operand.vmem [shape: f32[1,128], index: 5, kind: input, shape index: {}]   ;;  %s1467_s6 = inlined_call_operand.hbm [shape: f32[8,128], index: 6, kind: output, shape index: {}]  }
   0x1   :  { %12 = vsyncpa [#allocation6], 0 }
   0x2   :  { %13 = vsyncpa [#allocation4], 0  ;;  %s1350_s21 = smov [#allocation5]   ;;  %s1256_s25 = scalar_lea.hbm %s1462_s1, 8192 }
   0x3   :  { %s29_s22 = sshll.u32 %s1350_s21, 4  ;;  %p1257_p0 = scmp.ne.s32.totalorder %s1462_s1, %s1256_s25  ;;  %s30_s22 = int_to_ptr.vmem [resolvable:$true] %s29_s22 }
   0x4   :  { %p1260_p1 = scmp.lt.u32.totalorder %s1256_s25, %s1462_s1 }
   0x6   :  { %p1262_p2 = pnand %p1260_p1, %p1257_p0 }
   0x8   :  { %1265 = shalt.err (!%p1262_p2)
}
   0x9   :  { %s1266_s30 = scalar_lea.vmem %s30_s22, 8192  ;;  %p1271_p4 = scmp.lt.s32.totalorder %s30_s22, %s30_s22 }
   0xa   :  { %p1267_p3 = scmp.ne.s32.totalorder %s30_s22, %s1266_s30  ;;  %p1272_p5 = scmp.lt.s32.totalorder %s1266_s30, %s1266_s30 }
   0xc   :  { %p1273_p6 = por %p1272_p5, %p1271_p4 }
   0xe   :  { %p1274_p7 = pnand %p1273_p6, %p1267_p3 }
  0x10   :  { %1277 = shalt.err (!%p1274_p7)
}
  0x11   :  { %s1351_s7 = smov 64   ;;  %s1352_s8 = smov 4  }
  0x12   :  { %35 = dma.hbm_to_vmem [thread:$0]  %s1462_s1, 8192, %s30_s22, [#allocation6], %s1351_s7, %s1351_s7, %s1352_s8  }
  0x13   :  { %s1353_s11 = smov [#allocation2]   ;;  %s1354_s13 = smov [#allocation7]  }
  0x14   :  { %s20_s12 = sshll.u32 %s1353_s11, 4  ;;  %s45_s14 = sshll.u32 %s1354_s13, 4  ;;  %s21_s12 = int_to_ptr.vmem [resolvable:$true] %s20_s12  ;;  %s46_s14 = int_to_ptr.vmem [resolvable:$true] %s45_s14 }
  0x15   :  { %s1278_s17 = scalar_lea.hbm %s1461_s0, 512 }
  0x16   :  { %p1279_p8 = scmp.ne.s32.totalorder %s1461_s0, %s1278_s17  ;;  %p1282_p9 = scmp.lt.u32.totalorder %s1278_s17, %s1461_s0 }
  0x18   :  { %p1284_p10 = pnand %p1282_p9, %p1279_p8 }
  0x1a   :  { %1287 = shalt.err (!%p1284_p10)
}
  0x1b   :  { %s1288_s1 = scalar_lea.vmem %s21_s12, 512  ;;  %p1293_p12 = scmp.lt.s32.totalorder %s21_s12, %s21_s12 }
  0x1c   :  { %p1289_p11 = scmp.ne.s32.totalorder %s21_s12, %s1288_s1  ;;  %p1294_p13 = scmp.lt.s32.totalorder %s1288_s1, %s1288_s1 }
  0x1e   :  { %p1295_p0 = por %p1294_p13, %p1293_p12 }
  0x20   :  { %p1296_p1 = pnand %p1295_p0, %p1289_p11 }
  0x22   :  { %1299 = shalt.err (!%p1296_p1)
}
  0x23   :  { %23 = dma.hbm_to_vmem [thread:$0]  %s1461_s0, 512, %s21_s12, [#allocation3]  }
  0x24   :  { %s1300_s26 = scalar_lea.hbm %s1465_s4, 2048 }
  0x25   :  { %p1301_p2 = scmp.ne.s32.totalorder %s1465_s4, %s1300_s26  ;;  %p1304_p3 = scmp.lt.u32.totalorder %s1300_s26, %s1465_s4 }
  0x27   :  { %p1306_p4 = pnand %p1304_p3, %p1301_p2 }
  0x29   :  { %1309 = shalt.err (!%p1306_p4)
}
  0x2a   :  { %s1310_s7 = scalar_lea.vmem %s46_s14, 2048  ;;  %p1315_p6 = scmp.lt.s32.totalorder %s46_s14, %s46_s14 }
  0x2b   :  { %p1311_p5 = scmp.ne.s32.totalorder %s46_s14, %s1310_s7  ;;  %p1316_p7 = scmp.lt.s32.totalorder %s1310_s7, %s1310_s7 }
  0x2d   :  { %p1317_p8 = por %p1316_p7, %p1315_p6 }
  0x2f   :  { %p1318_p9 = pnand %p1317_p8, %p1311_p5 }
  0x31   :  { %1321 = shalt.err (!%p1318_p9)
}
  0x32   :  { %s1355_s0 = smov 128   ;;  %s1356_s8 = smov 8  }
  0x33   :  { %51 = dma.hbm_to_vmem [thread:$0]  %s1465_s4, 2048, %s46_s14, [#allocation6], %s1355_s0, %s1355_s0, %s1356_s8  }
  0x34   :  { %1344 = dma.done.wait [#allocation3], 512  }
  0x35   :  { %1345 = vsyncadd [#allocation3], 4294966784 }
  0x36   :  { %1346 = dma.done.wait [#allocation6], 10240  }
  0x37   :  { %1347 = vsyncadd [#allocation6], 4294957056  ;;  %v1180_v0 = vld [vmem:[#allocation5 + $0x40] sm:$0xff]   ;;  %v1184_v4 = vld [vmem:[#allocation5 + $0x48] sm:$0xff]   ;;  %vm1358_vm0 = vmmov 0  }
  0x38   :  { %v1181_v1 = vld [vmem:[#allocation5 + $0xc0] sm:$0xff]   ;;  %1005 = vmatprep.subr.bf16.mxu0 %v1180_v0  ;;  %v1185_v5 = vld [vmem:[#allocation5 + $0xc8] sm:$0xff]   ;;  %v1188_v8 = vld [vmem:[#allocation5 + $0x50] sm:$0xff]  }
  0x39   :  { %v1182_v2 = vld [vmem:[#allocation5] sm:$0xff]   ;;  %1027 = vmatprep.subr.bf16.mxu1 %v1181_v1  ;;  %v1186_v6 = vld [vmem:[#allocation5 + $0x8] sm:$0xff]   ;;  %v1189_v9 = vld [vmem:[#allocation5 + $0xd0] sm:$0xff]  }
  0x3a   :  { %v1183_v3 = vld [vmem:[#allocation5 + $0x80] sm:$0xff]   ;;  %1006 = vmatpush3.bf16.msra.mxu0 %v1182_v2  ;;  %v1187_v7 = vld [vmem:[#allocation5 + $0x88] sm:$0xff]   ;;  %v1190_v10 = vld [vmem:[#allocation5 + $0x10] sm:$0xff]  }
  0x3b   :  { %1028 = vmatpush3.bf16.msra.mxu1 %v1183_v3  ;;  %1007 = vmatprep.subr.bf16.mxu0 %v1184_v4  ;;  %v1191_v11 = vld [vmem:[#allocation5 + $0x90] sm:$0xff]   ;;  %v1192_v12 = vld [vmem:[#allocation5 + $0x58] sm:$0xff]   ;;  %v1196_v16 = vld [vmem:[#allocation5 + $0x60] sm:$0xff]  }
  0x3c   :  { %1029 = vmatprep.subr.bf16.mxu1 %v1185_v5  ;;  %v1193_v13 = vld [vmem:[#allocation5 + $0xd8] sm:$0xff]   ;;  %v1197_v17 = vld [vmem:[#allocation5 + $0xe0] sm:$0xff]   ;;  %v1200_v20 = vld [vmem:[#allocation5 + $0x68] sm:$0xff]  }
  0x3d   :  { %v1194_v14 = vld [vmem:[#allocation5 + $0x18] sm:$0xff]   ;;  %v1198_v18 = vld [vmem:[#allocation5 + $0x20] sm:$0xff]   ;;  %v1201_v21 = vld [vmem:[#allocation5 + $0xe8] sm:$0xff]  }
  0x3e   :  { %1008 = vmatpush3.bf16.msra.mxu0 %v1186_v6  ;;  %v1195_v15 = vld [vmem:[#allocation5 + $0x98] sm:$0xff]   ;;  %v1199_v19 = vld [vmem:[#allocation5 + $0xa0] sm:$0xff]   ;;  %v1202_v22 = vld [vmem:[#allocation5 + $0x28] sm:$0xff]  }
  0x3f   :  { %1030 = vmatpush3.bf16.msra.mxu1 %v1187_v7  ;;  %1009 = vmatprep.subr.bf16.mxu0 %v1188_v8  ;;  %v1203_v23 = vld [vmem:[#allocation5 + $0xa8] sm:$0xff]   ;;  %v1204_v24 = vld [vmem:[#allocation5 + $0x70] sm:$0xff]   ;;  %v1208_v28 = vld [vmem:[#allocation5 + $0x78] sm:$0xff]  }
  0x40   :  { %1031 = vmatprep.subr.bf16.mxu1 %v1189_v9  ;;  %v1205_v25 = vld [vmem:[#allocation5 + $0xf0] sm:$0xff]   ;;  %v1209_v29 = vld [vmem:[#allocation5 + $0xf8] sm:$0xff]   ;;  %v64_v32 = vld [vmem:[#allocation2] sm:$0xff] }
  0x41   :  { %v1206_v26 = vld [vmem:[#allocation5 + $0x30] sm:$0xff]   ;;  %v1210_v30 = vld [vmem:[#allocation5 + $0x38] sm:$0xff]   ;;  %v1432_v33 = vld [vmem:[#allocation2 + $0x8] sm:$0xff]  ;;  %v932_v34 = vcombine.high %v64_v32, %v64_v32  ;;  %v931_v37 = vcombine.low %v64_v32, %v64_v32  ;;  %v68_v53 = vunpack.c.l.bf16 %v64_v32  ;;  %v69_v54 = vunpack.c.h.bf16 %v64_v32 }
  0x42   :  { %1010 = vmatpush3.bf16.msra.mxu0 %v1190_v10  ;;  %v1207_v27 = vld [vmem:[#allocation5 + $0xb0] sm:$0xff]   ;;  %v1211_v31 = vld [vmem:[#allocation5 + $0xb8] sm:$0xff]   ;;  %v1216_v35 = vld [vmem:[#allocation5 + $0x140] sm:$0xff]   ;;  %v934_v36 = vcombine.high %v1432_v33, %v1432_v33  ;;  %v933_v38 = vcombine.low %v1432_v33, %v1432_v33  ;;  %v70_v61 = vunpack.c.l.bf16 %v1432_v33  ;;  %v71_v3 = vunpack.c.h.bf16 %v1432_v33 }
  0x43   :  { %1032 = vmatpush3.bf16.msra.mxu1 %v1191_v11  ;;  %1011 = vmatprep.subr.bf16.mxu0 %v1192_v12  ;;  %v1217_v39 = vld [vmem:[#allocation5 + $0x1c0] sm:$0xff]   ;;  %v1220_v42 = vld [vmem:[#allocation5 + $0x148] sm:$0xff]   ;;  %v1224_v46 = vld [vmem:[#allocation5 + $0x150] sm:$0xff]   ;;  %v76_v59 = vmul.f32 %v68_v53, %v68_v53  ;;  %v77_v60 = vmul.f32 %v69_v54, %v69_v54 }
  0x44   :  { %1033 = vmatprep.subr.bf16.mxu1 %v1193_v13  ;;  %665 = vmatprep.mubr.bf16.mxu0 %v932_v34  ;;  %v1218_v40 = vld [vmem:[#allocation5 + $0x100] sm:$0xff]   ;;  %v1221_v43 = vld [vmem:[#allocation5 + $0x1c8] sm:$0xff]   ;;  %v1225_v47 = vld [vmem:[#allocation5 + $0x1d0] sm:$0xff]   ;;  %v78_v4 = vmul.f32 %v70_v61, %v70_v61  ;;  %v79_v9 = vmul.f32 %v71_v3, %v71_v3 }
  0x45   :  { %705 = vmatprep.mubr.bf16.mxu1 %v934_v36  ;;  %v1219_v41 = vld [vmem:[#allocation5 + $0x180] sm:$0xff]   ;;  %v1222_v44 = vld [vmem:[#allocation5 + $0x108] sm:$0xff]   ;;  %v1226_v48 = vld [vmem:[#allocation5 + $0x110] sm:$0xff]   ;;  %v84_v2 = vadd.f32 %v77_v60, %v76_v59  ;;  %v1359_v59 = vmov 0.0  }
  0x46   :  { %1012 = vmatpush3.bf16.msra.mxu0 %v1194_v14  ;;  %v1223_v45 = vld [vmem:[#allocation5 + $0x188] sm:$0xff]   ;;  %v1227_v49 = vld [vmem:[#allocation5 + $0x190] sm:$0xff]   ;;  %v1228_v50 = vld [vmem:[#allocation5 + $0x158] sm:$0xff]  }
  0x47   :  { %1034 = vmatpush3.bf16.msra.mxu1 %v1195_v15  ;;  %1013 = vmatprep.subr.bf16.mxu0 %v1196_v16  ;;  %v1229_v51 = vld [vmem:[#allocation5 + $0x1d8] sm:$0xff]   ;;  %v1232_v56 = vld [vmem:[#allocation5 + $0x160] sm:$0xff]   ;;  %v1236_v63 = vld [vmem:[#allocation5 + $0x168] sm:$0xff]   ;;  %v85_v11 = vadd.f32 %v84_v2, %v78_v4 }
  0x48   :  { %1035 = vmatprep.subr.bf16.mxu1 %v1197_v17  ;;  %v1230_v52 = vld [vmem:[#allocation5 + $0x118] sm:$0xff]   ;;  %v1233_v57 = vld [vmem:[#allocation5 + $0x1e0] sm:$0xff]   ;;  %v1237_v0 = vld [vmem:[#allocation5 + $0x1e8] sm:$0xff]  }
  0x49   :  { %v1231_v55 = vld [vmem:[#allocation5 + $0x198] sm:$0xff]   ;;  %v1234_v58 = vld [vmem:[#allocation5 + $0x120] sm:$0xff]   ;;  %v1238_v1 = vld [vmem:[#allocation5 + $0x128] sm:$0xff]   ;;  %v86_v17 = vadd.f32 %v85_v11, %v79_v9 }
  0x4a   :  { %1014 = vmatpush3.bf16.msra.mxu0 %v1198_v18  ;;  %v1235_v62 = vld [vmem:[#allocation5 + $0x1a0] sm:$0xff]   ;;  %v1239_v5 = vld [vmem:[#allocation5 + $0x1a8] sm:$0xff]   ;;  %v1240_v6 = vld [vmem:[#allocation5 + $0x170] sm:$0xff]  }
  0x4b   :  { %1036 = vmatpush3.bf16.msra.mxu1 %v1199_v19  ;;  %1015 = vmatprep.subr.bf16.mxu0 %v1200_v20  ;;  %v1241_v7 = vld [vmem:[#allocation5 + $0x1f0] sm:$0xff]   ;;  %v1244_v12 = vld [vmem:[#allocation5 + $0x178] sm:$0xff]   ;;  %v822_v36 = vld [vmem:[#allocation7 + $0x8] sm:$0xff] }
  0x4c   :  { %1037 = vmatprep.subr.bf16.mxu1 %v1201_v21  ;;  %v1242_v8 = vld [vmem:[#allocation5 + $0x130] sm:$0xff]   ;;  %v1245_v13 = vld [vmem:[#allocation5 + $0x1f8] sm:$0xff]   ;;  %v833_v54 = vld [vmem:[#allocation7 + $0x60] sm:$0xff] }
  0x4d   :  { %v1243_v10 = vld [vmem:[#allocation5 + $0x1b0] sm:$0xff]   ;;  %v1246_v14 = vld [vmem:[#allocation5 + $0x138] sm:$0xff]  }
  0x4e   :  { %1016 = vmatpush3.bf16.msra.mxu0 %v1202_v22  ;;  %v1247_v15 = vld [vmem:[#allocation5 + $0x1b8] sm:$0xff]   ;;  %v66_v16 = vld [vmem:[#allocation2 + $0x10] sm:$0xff] }
  0x4f   :  { %1038 = vmatpush3.bf16.msra.mxu1 %v1203_v23  ;;  %1017 = vmatprep.subr.bf16.mxu0 %v1204_v24  ;;  %v936_v18 = vcombine.high %v66_v16, %v66_v16  ;;  %v67_v19 = vld [vmem:[#allocation2 + $0x18] sm:$0xff]  ;;  %v935_v20 = vcombine.low %v66_v16, %v66_v16  ;;  %v72_v21 = vunpack.c.l.bf16 %v66_v16  ;;  %v73_v22 = vunpack.c.h.bf16 %v66_v16 }
  0x50   :  { %1039 = vmatprep.subr.bf16.mxu1 %v1205_v25  ;;  %v938_v23 = vcombine.high %v67_v19, %v67_v19  ;;  %v937_v24 = vcombine.low %v67_v19, %v67_v19  ;;  %v74_v25 = vunpack.c.l.bf16 %v67_v19 }
  0x52   :  { %1018 = vmatpush3.bf16.msra.mxu0 %v1206_v26  ;;  %v75_v26 = vunpack.c.h.bf16 %v67_v19 }
  0x53   :  { %1040 = vmatpush3.bf16.msra.mxu1 %v1207_v27  ;;  %1019 = vmatprep.subr.bf16.mxu0 %v1208_v28  ;;  %v80_v27 = vmul.f32 %v72_v21, %v72_v21  ;;  %v81_v28 = vmul.f32 %v73_v22, %v73_v22 }
  0x54   :  { %1041 = vmatprep.subr.bf16.mxu1 %v1209_v29  ;;  %v82_v29 = vmul.f32 %v74_v25, %v74_v25  ;;  %v813_v25 = vlaneseq }
  0x56   :  { %1020 = vmatpush3.bf16.msra.mxu0 %v1210_v30  ;;  %v87_v30 = vadd.f32 %v86_v17, %v80_v27  ;;  %v810_v27 = vld [vmem:[%s1464_s3] sm:$0x1]  ;;  %s1360_s3 = smov [#allocation8]  }
  0x57   :  { %1042 = vmatpush3.bf16.msra.mxu1 %v1211_v31  ;;  %1049 = vmatprep.subr.bf16.mxu0 %v1216_v35  ;;  %v83_v31 = vmul.f32 %v75_v26, %v75_v26  ;;  %v821_v35 = vld [vmem:[#allocation7] sm:$0xff]  ;;  %v814_v26 = vshrl.u32 %v813_v25, 7  ;;  %s921_s15 = sshll.u32 %s1360_s3, 4  ;;  %s922_s15 = int_to_ptr.vmem [resolvable:$true] %s921_s15 }
  0x58   :  { %1071 = vmatprep.subr.bf16.mxu1 %v1217_v39  ;;  %v88_v32 = vadd.f32 %v87_v30, %v81_v28  ;;  %v823_v39 = vld [vmem:[#allocation7 + $0x10] sm:$0xff]  ;;  %v811_v28 = vsub.f32 0.0, %v810_v27  ;;  %s1322_s16 = scalar_lea.vmem %s922_s15, 128  ;;  %p1327_p11 = scmp.lt.s32.totalorder %s922_s15, %s922_s15 }
  0x59   :  { %666 = vmatmul.mubr.bf16.vlgmr.msra.gmra.mrb[0].mxu0 %v931_v37  ;;  %v1146_v37 = vpack.c.bf16 %v822_v36, %v821_v35  ;;  %p1323_p10 = scmp.ne.s32.totalorder %s922_s15, %s1322_s16  ;;  %p1328_p12 = scmp.lt.s32.totalorder %s1322_s16, %s1322_s16 }
  0x5a   :  { %706 = vmatmul.mubr.bf16.vlgmr.msra.gmra.mrb[0].mxu1 %v933_v38  ;;  %1050 = vmatpush3.bf16.msra.mxu0 %v1218_v40  ;;  %v89_v33 = vadd.f32 %v88_v32, %v82_v29  ;;  %v1357_v38 = vmov 0.0|0.0   ;;  %v824_v40 = vld [vmem:[#allocation7 + $0x18] sm:$0xff]  ;;  %v815_v29 = vsub.s32 0, %v814_v26 }
  0x5b   :  { %1072 = vmatpush3.bf16.msra.mxu1 %v1219_v41  ;;  %1051 = vmatprep.subr.bf16.mxu0 %v1220_v42  ;;  %v1149_v41 = vpack.c.bf16 %v824_v40, %v823_v39  ;;  %v825_v42 = vld [vmem:[#allocation7 + $0x20] sm:$0xff]  ;;  %p1329_p13 = por %p1328_p12, %p1327_p11 }
  0x5c   :  { %1073 = vmatprep.subr.bf16.mxu1 %v1221_v43  ;;  %745 = vmatprep.mubr.bf16.mxu0 %v936_v18  ;;  %v90_v34 = vadd.f32 %v89_v33, %v83_v31  ;;  %v826_v43 = vld [vmem:[#allocation7 + $0x28] sm:$0xff]  ;;  %v816_v32 = vrot.slane %v811_v28, %v815_v29  ;;  %v1004_v39 = vld [vmem:[%s1466_s5] ss:$0 sm:$0xff] }
  0x5d   :  { %785 = vmatprep.mubr.bf16.mxu1 %v938_v23  ;;  %p1330_p0 = pnand %p1329_p13, %p1323_p10 }
  0x5e   :  { %1052 = vmatpush3.bf16.msra.mxu0 %v1222_v44  ;;  %91 = vadd.xlane.f32.xlu0 %v90_v34  ;;  %v1152_v44 = vpack.c.bf16 %v826_v43, %v825_v42 }
  0x5f   :  { %1074 = vmatpush3.bf16.msra.mxu1 %v1223_v45  ;;  %1053 = vmatprep.subr.bf16.mxu0 %v1224_v46  ;;  %v827_v45 = vld [vmem:[#allocation7 + $0x30] sm:$0xff]  ;;  %v828_v46 = vld [vmem:[#allocation7 + $0x38] sm:$0xff] }
  0x60   :  { %1075 = vmatprep.subr.bf16.mxu1 %v1225_v47  ;;  %v1155_v47 = vpack.c.bf16 %v828_v46, %v827_v45 }
  0x62   :  { %1054 = vmatpush3.bf16.msra.mxu0 %v1226_v48  ;;  %v829_v48 = vld [vmem:[#allocation7 + $0x40] sm:$0xff] }
  0x63   :  { %1076 = vmatpush3.bf16.msra.mxu1 %v1227_v49  ;;  %1055 = vmatprep.subr.bf16.mxu0 %v1228_v50  ;;  %v830_v49 = vld [vmem:[#allocation7 + $0x48] sm:$0xff] }
  0x64   :  { %1077 = vmatprep.subr.bf16.mxu1 %v1229_v51  ;;  %v1158_v50 = vpack.c.bf16 %v830_v49, %v829_v48  ;;  %v831_v51 = vld [vmem:[#allocation7 + $0x50] sm:$0xff] }
  0x66   :  { %1056 = vmatpush3.bf16.msra.mxu0 %v1230_v52  ;;  %v832_v52 = vld [vmem:[#allocation7 + $0x58] sm:$0xff] }
  0x67   :  { %1078 = vmatpush3.bf16.msra.mxu1 %v1231_v55  ;;  %1057 = vmatprep.subr.bf16.mxu0 %v1232_v56  ;;  %v1161_v53 = vpack.c.bf16 %v832_v52, %v831_v51  ;;  %v834_v55 = vld [vmem:[#allocation7 + $0x68] sm:$0xff] }
  0x68   :  { %1079 = vmatprep.subr.bf16.mxu1 %v1233_v57  ;;  %v1164_v56 = vpack.c.bf16 %v834_v55, %v833_v54  ;;  %v835_v57 = vld [vmem:[#allocation7 + $0x70] sm:$0xff] }
  0x6a   :  { %1058 = vmatpush3.bf16.msra.mxu0 %v1234_v58  ;;  %v836_v58 = vld [vmem:[#allocation7 + $0x78] sm:$0xff] }
  0x6b   :  { %1080 = vmatpush3.bf16.msra.mxu1 %v1235_v62  ;;  %1059 = vmatprep.subr.bf16.mxu0 %v1236_v63  ;;  %v1167_v60 = vpack.c.bf16 %v836_v58, %v835_v57 }
  0x6c   :  { %1081 = vmatprep.subr.bf16.mxu1 %v1237_v0 }
  0x6e   :  { %1060 = vmatpush3.bf16.msra.mxu0 %v1238_v1 }
  0x6f   :  { %1082 = vmatpush3.bf16.msra.mxu1 %v1239_v5  ;;  %1061 = vmatprep.subr.bf16.mxu0 %v1240_v6 }
  0x70   :  { %1083 = vmatprep.subr.bf16.mxu1 %v1241_v7 }
  0x72   :  { %1062 = vmatpush3.bf16.msra.mxu0 %v1242_v8 }
  0x73   :  { %1084 = vmatpush3.bf16.msra.mxu1 %v1243_v10  ;;  %1063 = vmatprep.subr.bf16.mxu0 %v1244_v12 }
  0x74   :  { %1085 = vmatprep.subr.bf16.mxu1 %v1245_v13  ;;  %v1003_v13 = vld [vmem:[%s1463_s2] ss:$0 sm:$0xff] }
  0x76   :  { %1064 = vmatpush3.bf16.msra.mxu0 %v1246_v14 }
  0x77   :  { %1086 = vmatpush3.bf16.msra.mxu1 %v1247_v15  ;;  %1145 = vmatprep.subr.bf16.mxu0 %v1357_v38 }
  0x79   :  { %746 = vmatmul.mubr.bf16.vlgmr.msra.gmra.mrb[4].mxu0 %v935_v20 }
  0x7a   :  { %786 = vmatmul.mubr.bf16.vlgmr.msra.gmra.mrb[4].mxu1 %v937_v24  ;;  %1147 = vmatpush3.bf16.msra.mxu0 %v1146_v37 }
  0x7b   :  { %1148 = vmatprep.subr.bf16.mxu0 %v1357_v38  ;;  %1142 = vmatprep.mubr.msk.f32.mxu0 %vm1358_vm0, %v1359_v59 }
  0x7e   :  { %1150 = vmatpush3.bf16.msra.mxu0 %v1149_v41 }
  0x7f   :  { %1151 = vmatprep.subr.bf16.mxu0 %v1357_v38 }
  0x82   :  { %1153 = vmatpush3.bf16.msra.mxu0 %v1152_v44 }
  0x83   :  { %1154 = vmatprep.subr.bf16.mxu0 %v1357_v38 }
  0x86   :  { %1156 = vmatpush3.bf16.msra.mxu0 %v1155_v47 }
  0x87   :  { %1157 = vmatprep.subr.bf16.mxu0 %v1357_v38 }
  0x8a   :  { %1159 = vmatpush3.bf16.msra.mxu0 %v1158_v50 }
  0x8b   :  { %1160 = vmatprep.subr.bf16.mxu0 %v1357_v38 }
  0x8e   :  { %1162 = vmatpush3.bf16.msra.mxu0 %v1161_v53 }
  0x8f   :  { %1163 = vmatprep.subr.bf16.mxu0 %v1357_v38 }
  0x92   :  { %1165 = vmatpush3.bf16.msra.mxu0 %v1164_v56 }
  0x93   :  { %1166 = vmatprep.subr.bf16.mxu0 %v1357_v38 }
  0x96   :  { %1168 = vmatpush3.bf16.msra.mxu0 %v1167_v60 }
  0xeb   :  { %v92_v8 = vpop.xlane.xlu0 %91 }
  0xec   :  { %v800_v21 = vadd.f32 %v1003_v13, %v92_v8 }
 0x12c   :  { %v1021_v61 = vpop.f32.mrb[0].mxu0 }
 0x12d   :  { %v1043_v62 = vpop.f32.mrb[0].mxu1  ;;  %v1022_v63 = vpop.f32.mrb[1].mxu0 }
 0x12e   :  { %v1023_v0 = vadd.f32 %v1022_v63, %v1021_v61  ;;  %v1044_v1 = vpop.f32.mrb[1].mxu1  ;;  %v1024_v2 = vpop.f32.mrb[2].mxu0 }
 0x12f   :  { %v1045_v3 = vadd.f32 %v1044_v1, %v1043_v62  ;;  %v1046_v4 = vpop.f32.mrb[2].mxu1  ;;  %v1025_v5 = vpop.f32.mrb[3].mxu0 }
 0x130   :  { %v1047_v6 = vpop.f32.mrb[3].mxu1 }
 0x131   :  { %v708_v7 = vadd.f32 %v1045_v3, %v1023_v0 }
 0x14c   :  { %v1065_v9 = vpop.f32.mrb[4].mxu0 }
 0x14d   :  { %v1087_v10 = vpop.f32.mrb[4].mxu1  ;;  %v1066_v11 = vpop.f32.mrb[5].mxu0 }
 0x14e   :  { %v1088_v12 = vpop.f32.mrb[5].mxu1  ;;  %v1067_v14 = vadd.f32 %v1066_v11, %v1065_v9  ;;  %v1068_v16 = vpop.f32.mrb[6].mxu0 }
 0x14f   :  { %v1089_v15 = vadd.f32 %v1088_v12, %v1087_v10  ;;  %v1090_v17 = vpop.f32.mrb[6].mxu1  ;;  %v1069_v18 = vpop.f32.mrb[7].mxu0 }
 0x150   :  { %v1091_v19 = vpop.f32.mrb[7].mxu1  ;;  %v748_v20 = vadd.f32 %v1067_v14, %v708_v7 }
 0x152   :  { %v788_v22 = vadd.f32 %v1089_v15, %v748_v20 }
 0x154   :  { %v801_v23 = vadd.f32 %v800_v21, %v788_v22 }
 0x156   :  { %v802_v24 = vmax.f32 %v801_v23, 0.0 }
 0x158   :  { %1252 = vrsqrt.f32 %v802_v24  ;;  %vm805_vm1 = vcmp.eq.f32.partialorder %v802_v24, inf  ;;  %v808_v33 = vand.u32 2147483648, %v802_v24  ;;  %vm807_vm2 = vcmp.eq.f32.partialorder %v802_v24, 0.0 }
 0x162   :  { %v1253_v30 = vpop.eup %1252 }
 0x163   :  { %v804_v31 = vmul.f32 %v1253_v30, %v802_v24 }
 0x165   :  { %v806_v34 = vsel %vm805_vm1, %v802_v24, %v804_v31 }
 0x166   :  { %v809_v35 = vsel %vm807_vm2, %v808_v33, %v806_v34 }
 0x167   :  { %v818_v36 = vmul.f32 %v816_v32, %v809_v35 }
 0x169   :  { %v819_v37 = vmul.f32 1.442695, %v818_v36 }
 0x16b   :  { %1254 = vpow2.f32 %v819_v37 }
 0x175   :  { %v1255_v38 = vpop.eup %1254 }
 0x176   :  { %1143 = vmatmul.mubr.f32.vlgmr.msra.gmra.mrb[8].mxu0 %v1255_v38 }
 0x249   :  { %v910_v40 = vpop.f32.mrb[8].mxu0 }
 0x24a   :  { %v911_v41 = vadd.f32 %v1004_v39, %v910_v40  ;;  %v1144_v42 = vpop.f32.mrb[9].mxu0 }
 0x24c   :  { %914 = vst [vmem:[#allocation8] sm:$0xff] %v911_v41 }
 0x24d   :  { %1333 = shalt.err (!%p1330_p0)
}
 0x24e   :  { %s1334_s19 = scalar_lea.hbm %s1467_s6, 128 }
 0x24f   :  { %p1335_p1 = scmp.ne.s32.totalorder %s1467_s6, %s1334_s19  ;;  %p1338_p2 = scmp.lt.u32.totalorder %s1334_s19, %s1467_s6 }
 0x251   :  { %p1340_p3 = pnand %p1338_p2, %p1335_p1 }
 0x253   :  { %1343 = shalt.err (!%p1340_p3)
}
 0x254   :  { %924 = dma.vmem_to_hbm [thread:$0]  %s922_s15, 128, %s1467_s6, [#allocation4]  }
 0x255   :  { %1348 = dma.done.wait [#allocation4], 128  }
 0x256   :  { %1349 = vsyncadd [#allocation4], 4294967168 }
 0x257   :  { %928 = vsyncpa [#allocation3], 1 }
 0x258   :  { %929 = vsyncpa [#allocation6], 1 }
 0x259   :  { %930 = vsyncpa [#allocation4], 1 }

</bundles_post_ra>
